<compile_context>
chip_gen: v7x
topology: tpu7x:2x2x1
jax: 0.10.0
libtpu: 0.0.40
codegen_flags: <defaults>
</compile_context>

<pallas_src>
import functools

import jax
import jax.numpy as jnp
from jax.experimental import pallas as pl
from jax.experimental.pallas import tpu as pltpu


def _round_up(x, m):
    return ((x + m - 1) // m) * m


def _vmem_limit_bytes():
    """Per-generation scoped-VMEM limit (v5e/v6e: 128 MiB phys, v7x: 64 MiB)."""
    try:
        phys = pltpu.get_tpu_info().vmem_capacity_bytes
    except Exception:
        phys = 64 * 1024 * 1024  # conservative (v7x-sized) fallback
    # ~75% of physical, capped so older chips still leave compiler headroom.
    return min(int(phys) * 3 // 4, 100 * 1024 * 1024)


def _choose_tiles(B, d_in, nc_pad, x_itemsize, tile_budget):
    """Pick (tb, tk, k_resident) so double-buffered tiles fit the VMEM budget."""
    bias_bytes = nc_pad * 4
    # per output row: double-buffered f32 out tile + f32 accumulator scratch
    out_row = 2 * nc_pad * 4 + nc_pad * 4

    def max_tb(tk, w_bufs):
        fixed = w_bufs * tk * nc_pad * 2 + bias_bytes
        per_row = 2 * tk * x_itemsize + out_row
        return max(0, (tile_budget - fixed) // per_row)

    # Preferred: fully resident (single-buffered) fused weight, one MXU matmul
    # per batch tile.
    tk = d_in
    w_bufs = 1
    if max_tb(d_in, 1) < min(B, 64):
        # K-tiling fallback: largest multiple-of-128 divisor of d_in whose
        # double-buffered weight tile still leaves room for a decent x tile.
        if d_in % 128 == 0:
            w_bufs = 2
            tk = 128
            for m in range(d_in // 128, 0, -1):
                cand = m * 128
                if d_in % cand == 0 and max_tb(cand, 2) >= min(B, 64):
                    tk = cand
                    break
        # else: keep tk = d_in (a ragged K block would feed unmasked garbage
        # into the accumulator), accept a smaller batch tile.

    # Batch tile: full batch for tiny B (block dim must be 8-aligned or equal
    # to the full axis), otherwise >=2 grid steps so v7x's second TensorCore
    # and the DMA double-buffering actually get used.
    if B <= 16:
        tb = B
    else:
        tb_desired = min(1024, _round_up(pl.cdiv(B, 2), 16))
        tb_cap = (max_tb(tk, w_bufs) // 8) * 8
        tb = max(8, min(tb_desired, tb_cap)) if tb_cap >= 8 else 8
    return tb, tk, (tk == d_in)


def _spuco_fused_kernel(x_ref, w_ref, b_ref, out_ref, acc_ref):
    # x_ref  : (TB, TK)      native-dtype batch tile (cast to bf16 on the VPU,
    #                        free under DMA slack; avoids a wrapper HBM pass)
    # w_ref  : (TK, NC_PAD)  bf16 fused weight tile
    # b_ref  : (1, NC_PAD)   f32  fused bias (resident, single-buffered)
    # out_ref: (TB, NC_PAD)  f32  logits tile (lane-dense, NC_PAD % 128 == 0)
    # acc_ref: (TB, NC_PAD)  f32  accumulator scratch (K-tiling support)
    k = pl.program_id(1)

    @pl.when(k == 0)
    def _():
        acc_ref[...] = jnp.zeros_like(acc_ref)

    acc_ref[...] += jnp.dot(
        x_ref[...].astype(jnp.bfloat16), w_ref[...],
        preferred_element_type=jnp.float32)

    @pl.when(k == pl.num_programs(1) - 1)
    def _():
        out_ref[...] = (acc_ref[...] + b_ref[...]).astype(out_ref.dtype)


def fold_spuco_params(wb, bb, rw, wc, bc, *, compute_dtype=jnp.bfloat16):
    """One-time weight preparation (outside the hot path).

    Folds backbone Linear, reweight projection head and classifier into a
    single (D_in, NC_PAD) weight and (1, NC_PAD) bias, zero-padded to a
    lane-dense (multiple-of-128) class dimension. Fold in f32, cast after.
    """
    num_classes = wc.shape[1]
    nc_pad = max(128, _round_up(num_classes, 128))
    w_fused = (wb * rw) @ wc                  # (D_in, num_classes) f32
    b_fused = (bb * rw) @ wc + bc             # (1,   num_classes)  f32
    pad = nc_pad - num_classes
    w_fused = jnp.pad(w_fused, ((0, 0), (0, pad))).astype(compute_dtype)
    b_fused = jnp.pad(b_fused, ((0, 0), (0, pad))).astype(jnp.float32)
    return w_fused, b_fused, num_classes


@functools.partial(jax.jit, static_argnames=("num_classes",))
def spuco_forward(x_nchw, w_fused, b_fused, num_classes):
    """Fused SpuCoModel forward. x_nchw: (B, C, H, W) -> (B, num_classes) f32 logits."""
    B = x_nchw.shape[0]
    d_in = x_nchw.shape[1] * x_nchw.shape[2] * x_nchw.shape[3]
    nc_pad = w_fused.shape[1]

    # Flatten only (contiguous reshape, no copy). No dtype convert and no
    # jnp.pad here — the kernel casts on-chip and the last batch block is
    # allowed to be ragged (OOB output stores are masked by Pallas).
    x = x_nchw.reshape(B, d_in)

    vmem_limit = _vmem_limit_bytes()
    tb, tk, k_resident = _choose_tiles(
        B, d_in, nc_pad, x.dtype.itemsize, int(vmem_limit * 0.9))
    grid = (pl.cdiv(B, tb), d_in // tk)

    if k_resident:
        # Constant index_map -> keep a single VMEM copy of the fused weight.
        w_spec = pl.BlockSpec((tk, nc_pad), lambda i, k: (k, 0),
                              pipeline_mode=pl.Buffered(1))
    else:
        # Weight tile changes along the K axis -> keep default double buffering.
        w_spec = pl.BlockSpec((tk, nc_pad), lambda i, k: (k, 0))
    b_spec = pl.BlockSpec((1, nc_pad), lambda i, k: (0, 0),
                          pipeline_mode=pl.Buffered(1))

    cost = pl.CostEstimate(
        flops=2 * B * d_in * nc_pad,
        transcendentals=0,
        bytes_accessed=(B * d_in * x.dtype.itemsize
                        + d_in * nc_pad * w_fused.dtype.itemsize
                        + nc_pad * 4
                        + B * nc_pad * 4),
    )

    out = pl.pallas_call(
        _spuco_fused_kernel,
        out_shape=jax.ShapeDtypeStruct((B, nc_pad), jnp.float32),
        grid_spec=pltpu.PrefetchScalarGridSpec(
            num_scalar_prefetch=0,
            grid=grid,
            in_specs=[
                pl.BlockSpec((tb, tk), lambda i, k: (i, k)),  # x: batch/K tiled
                w_spec,                                       # fused weight
                b_spec,                                       # fused bias
            ],
            out_specs=pl.BlockSpec((tb, nc_pad), lambda i, k: (i, 0)),
            scratch_shapes=[pltpu.VMEM((tb, nc_pad), jnp.float32)],
        ),
        compiler_params=pltpu.CompilerParams(
            # Batch axis is embarrassingly parallel (both TCs on v7x); the K
            # axis carries the accumulator and must stay "arbitrary".
            dimension_semantics=("parallel", "arbitrary"),
            vmem_limit_bytes=vmem_limit,
        ),
        cost_estimate=cost,
    )(x, w_fused, b_fused)

    # Only the class-dim slice is needed; batch is already exact (no padding).
    return out[:, :num_classes]


if __name__ == "__main__":
    # Small demo shapes consistent with the module.
    B, C, H, W = 2, 4, 16, 16
    D_IN = C * H * W                    # 1024
    REPRESENTATION_DIM = 64
    NUM_CLASSES = 8
    KAPPA = 2.0

    key = jax.random.PRNGKey(0)
    kx, kx2, kwb, kbb, kwc, kbc = jax.random.split(key, 6)

    x = jax.random.normal(kx, (B, C, H, W), dtype=jnp.float32)

    # Deterministic synthetic parameters, stored (in_features, out_features)
    # so the folded compute is plain x @ W.
    wb = jax.random.normal(kwb, (D_IN, REPRESENTATION_DIM), dtype=jnp.float32) * 0.02
    bb = jax.random.normal(kbb, (1, REPRESENTATION_DIM), dtype=jnp.float32) * 0.02
    rw = jnp.array([1.0 / KAPPA ** i for i in range(REPRESENTATION_DIM)],
                   dtype=jnp.float32).reshape(1, REPRESENTATION_DIM)
    wc = jax.random.normal(kwc, (REPRESENTATION_DIM, NUM_CLASSES), dtype=jnp.float32) * 0.1
    bc = jax.random.normal(kbc, (1, NUM_CLASSES), dtype=jnp.float32) * 0.1

    # One-time fold (outside the hot path), then the fused kernel.
    w_fused, b_fused, num_classes = fold_spuco_params(wb, bb, rw, wc, bc)
    out = jax.block_until_ready(spuco_forward(x, w_fused, b_fused, num_classes))
    assert out.shape == (B, NUM_CLASSES)

    x_flat = x.reshape(B, D_IN)

    # Check 1: the exact arithmetic path the kernel runs (bf16 operands, f32 acc).
    ref_same = (
        jnp.dot(x_flat.astype(jnp.bfloat16), w_fused,
                preferred_element_type=jnp.float32)
        + b_fused
    )[:, :NUM_CLASSES]
    assert jnp.allclose(out, ref_same, atol=2e-3, rtol=2e-3)

    # Check 2: original (unfolded, full-f32) module semantics, looser tolerance
    # because of the bf16 operand cast on the matmul path.
    ref_f32 = ((x_flat @ wb + bb) * rw) @ wc + bc
    assert jnp.allclose(out, ref_f32, atol=3e-2, rtol=3e-2)

    # Check 3: larger batch to exercise >=2 batch tiles and a ragged last block
    # (no jnp.pad copy of x on this path).
    B2 = 40
    x2 = jax.random.normal(kx2, (B2, C, H, W), dtype=jnp.float32)
    out2 = jax.block_until_ready(spuco_forward(x2, w_fused, b_fused, num_classes))
    assert out2.shape == (B2, NUM_CLASSES)
    x2_flat = x2.reshape(B2, D_IN)
    ref2_f32 = ((x2_flat @ wb + bb) * rw) @ wc + bc
    assert jnp.allclose(out2, ref2_f32, atol=3e-2, rtol=3e-2)

    print("KERNEL_OK")
</pallas_src>

<mosaic_0001>
module attributes {stable_mosaic.version = 11 : i64} {
  func.func @_spuco_fused_kernel(%arg0: i32, %arg1: i32, %arg2: memref<2x1024xf32, #tpu.memory_space<vmem>>, %arg3: memref<1024x128xbf16, #tpu.memory_space<vmem>>, %arg4: memref<1x128xf32, #tpu.memory_space<vmem>>, %arg5: memref<2x128xf32, #tpu.memory_space<vmem>>, %arg6: memref<2x128xf32, #tpu.memory_space<vmem>>) attributes {dimension_semantics = [#tpu.dimension_semantics<parallel>, #tpu.dimension_semantics<arbitrary>], iteration_bounds = array<i64: 1, 1>, scalar_prefetch = 0 : i64, scratch_operands = 1 : i64, tpu.core_type = #tpu.core_type<tc>, window_params = [{transform_indices = @transform_0, window_bounds = array<i64: 2, 1024>}, {pipeline_mode = #tpu.pipeline_mode<synchronous>, transform_indices = @transform_1, window_bounds = array<i64: 1024, 128>}, {pipeline_mode = #tpu.pipeline_mode<synchronous>, transform_indices = @transform_2, window_bounds = array<i64: 1, 128>}, {transform_indices = @transform_3, window_bounds = array<i64: 2, 128>}]} {
    %c0_i32 = arith.constant 0 : i32
    %0 = arith.cmpi eq, %arg1, %c0_i32 : i32
    %1 = arith.extui %0 : i1 to i32
    %c0_i32_0 = arith.constant 0 : i32
    %2 = arith.cmpi ne, %1, %c0_i32_0 : i32
    scf.if %2 {
      %cst_10 = arith.constant 0.000000e+00 : f32
      %13 = vector.broadcast %cst_10 : f32 to vector<2x128xf32>
      %c0_11 = arith.constant 0 : index
      %c0_12 = arith.constant 0 : index
      %14 = vector.load %arg6[%c0_11, %c0_12] : memref<2x128xf32, #tpu.memory_space<vmem>>, vector<2x128xf32>
      tpu.vector_store %arg6[%c0_11, %c0_12], %13 {strides = array<i32>} : memref<2x128xf32, #tpu.memory_space<vmem>>, vector<2x128xf32>,
    } else {
    }
    %c0 = arith.constant 0 : index
    %c0_1 = arith.constant 0 : index
    %3 = vector.load %arg6[%c0, %c0_1] : memref<2x128xf32, #tpu.memory_space<vmem>>, vector<2x128xf32>
    %c0_2 = arith.constant 0 : index
    %c0_3 = arith.constant 0 : index
    %4 = vector.load %arg2[%c0_2, %c0_3] : memref<2x1024xf32, #tpu.memory_space<vmem>>, vector<2x1024xf32>
    %5 = arith.truncf %4 : vector<2x1024xf32> to vector<2x1024xbf16>
    %c0_4 = arith.constant 0 : index
    %c0_5 = arith.constant 0 : index
    %6 = vector.load %arg3[%c0_4, %c0_5] : memref<1024x128xbf16, #tpu.memory_space<vmem>>, vector<1024x128xbf16>
    %cst = arith.constant dense<0.000000e+00> : vector<2x128xf32>
    %7 = tpu.matmul %5, %6, %cst {dimension_numbers = #tpu.dot_dimension_numbers<[1], [0], [0], [1], [0, 0, 1, 1], [], []>} : vector<2x1024xbf16>, vector<1024x128xbf16>, vector<2x128xf32> -> vector<2x128xf32>
    %8 = arith.addf %3, %7 : vector<2x128xf32>
    %c0_6 = arith.constant 0 : index
    %c0_7 = arith.constant 0 : index
    %9 = vector.load %arg6[%c0_6, %c0_7] : memref<2x128xf32, #tpu.memory_space<vmem>>, vector<2x128xf32>
    tpu.vector_store %arg6[%c0_6, %c0_7], %8 {strides = array<i32>} : memref<2x128xf32, #tpu.memory_space<vmem>>, vector<2x128xf32>,
    %c0_i32_8 = arith.constant 0 : i32
    %10 = arith.cmpi eq, %arg1, %c0_i32_8 : i32
    %11 = arith.extui %10 : i1 to i32
    %c0_i32_9 = arith.constant 0 : i32
    %12 = arith.cmpi ne, %11, %c0_i32_9 : i32
    scf.if %12 {
      %c0_10 = arith.constant 0 : index
      %c0_11 = arith.constant 0 : index
      %13 = vector.load %arg6[%c0_10, %c0_11] : memref<2x128xf32, #tpu.memory_space<vmem>>, vector<2x128xf32>
      %c0_12 = arith.constant 0 : index
      %c0_13 = arith.constant 0 : index
      %14 = vector.load %arg4[%c0_12, %c0_13] : memref<1x128xf32, #tpu.memory_space<vmem>>, vector<1x128xf32>
      %15 = vector.broadcast %14 : vector<1x128xf32> to vector<2x128xf32>
      %16 = arith.addf %13, %15 : vector<2x128xf32>
      %c0_14 = arith.constant 0 : index
      %c0_15 = arith.constant 0 : index
      %17 = vector.load %arg5[%c0_14, %c0_15] : memref<2x128xf32, #tpu.memory_space<vmem>>, vector<2x128xf32>
      tpu.vector_store %arg5[%c0_14, %c0_15], %16 {strides = array<i32>} : memref<2x128xf32, #tpu.memory_space<vmem>>, vector<2x128xf32>,
    } else {
    }
    return
  }
  func.func @transform_0(%arg0: i32, %arg1: i32) -> (i32, i32) {
    %c0_i32 = arith.constant 0 : i32
    return %arg0, %arg1 : i32, i32
  }
  func.func @transform_1(%arg0: i32, %arg1: i32) -> (i32, i32) {
    %c0_i32 = arith.constant 0 : i32
    %c0_i32_0 = arith.constant 0 : i32
    return %arg1, %c0_i32 : i32, i32
  }
  func.func @transform_2(%arg0: i32, %arg1: i32) -> (i32, i32) {
    %c0_i32 = arith.constant 0 : i32
    %c0_i32_0 = arith.constant 0 : i32
    %c0_i32_1 = arith.constant 0 : i32
    return %c0_i32, %c0_i32_0 : i32, i32
  }
  func.func @transform_3(%arg0: i32, %arg1: i32) -> (i32, i32) {
    %c0_i32 = arith.constant 0 : i32
    %c0_i32_0 = arith.constant 0 : i32
    return %arg0, %c0_i32 : i32, i32
  }
}

</mosaic_0001>

<bundles_post_ra>
// kernel: spuco_forward.1
= control target key start
LH: loop header
LB: loop body
LE: loop exit
PB: predicated region body
PF: predicated region fallthrough
CT: control target
= control target key end

     0   :  { %8 = vsyncpa [#allocation4], 0  ;;  %s1130_s0 = inlined_call_operand.vmem [shape: f32[2,1024], index: 0, kind: input, shape index: {}]   ;;  %s1131_s1 = inlined_call_operand.hbm [shape: bf16[1024,128], index: 1, kind: input, shape index: {}]   ;;  %s1132_s2 = inlined_call_operand.vmem [shape: f32[1,128], index: 2, kind: input, shape index: {}]   ;;  %s1133_s3 = inlined_call_operand.hbm [shape: f32[2,128], index: 3, kind: output, shape index: {}]  }
   0x1   :  { %9 = vsyncpa [#allocation5], 0  ;;  %s1065_s12 = smov [#allocation3]   ;;  %s1017_s16 = scalar_lea.hbm %s1131_s1, 8192 }
   0x2   :  { %s17_s13 = sshll.u32 %s1065_s12, 4  ;;  %p1018_p0 = scmp.ne.s32.totalorder %s1131_s1, %s1017_s16  ;;  %s18_s13 = int_to_ptr.vmem [resolvable:$true] %s17_s13 }
   0x3   :  { %p1021_p1 = scmp.lt.u32.totalorder %s1017_s16, %s1131_s1 }
   0x5   :  { %p1023_p2 = pnand %p1021_p1, %p1018_p0 }
   0x7   :  { %1026 = shalt.err (!%p1023_p2)
}
   0x8   :  { %s1027_s21 = scalar_lea.vmem %s18_s13, 8192  ;;  %p1032_p4 = scmp.lt.s32.totalorder %s18_s13, %s18_s13 }
   0x9   :  { %p1028_p3 = scmp.ne.s32.totalorder %s18_s13, %s1027_s21  ;;  %p1033_p5 = scmp.lt.s32.totalorder %s1027_s21, %s1027_s21 }
   0xb   :  { %p1034_p6 = por %p1033_p5, %p1032_p4 }
   0xd   :  { %p1035_p7 = pnand %p1034_p6, %p1028_p3 }
   0xf   :  { %1038 = shalt.err (!%p1035_p7)
}
  0x10   :  { %s1066_s22 = smov 64   ;;  %s1067_s23 = smov 4  }
  0x11   :  { %23 = dma.hbm_to_vmem [thread:$0]  %s1131_s1, 8192, %s18_s13, [#allocation4], %s1066_s22, %s1066_s22, %s1067_s23  }
  0x12   :  { %1061 = dma.done.wait [#allocation4], 8192  }
  0x13   :  { %1062 = vsyncadd [#allocation4], 4294959104  ;;  %v951_v0 = vld [vmem:[#allocation3 + $0x40] sm:$0xff]   ;;  %v955_v4 = vld [vmem:[#allocation3 + $0x48] sm:$0xff]   ;;  %v1068_v22 = vmov 1983009808   ;;  %v44_v24 = vlaneseq }
  0x14   :  { %v952_v1 = vld [vmem:[#allocation3 + $0xc0] sm:$0xff]   ;;  %857 = vmatprep.subr.bf16.mxu0 %v951_v0  ;;  %v956_v5 = vld [vmem:[#allocation3 + $0xc8] sm:$0xff]   ;;  %v959_v8 = vld [vmem:[#allocation3 + $0x50] sm:$0xff]   ;;  %v42_v23 = vunpack.c.l.s4 %v1068_v22  ;;  %s1070_s30 = smov [#allocation6]  }
  0x15   :  { %v953_v2 = vld [vmem:[#allocation3] sm:$0xff]   ;;  %879 = vmatprep.subr.bf16.mxu1 %v952_v1  ;;  %v957_v6 = vld [vmem:[#allocation3 + $0x8] sm:$0xff]   ;;  %v960_v9 = vld [vmem:[#allocation3 + $0xd0] sm:$0xff]   ;;  %v45_v30 = vshrl.u32 %v44_v24, 7  ;;  %s783_s4 = sshll.u32 %s1070_s30, 4  ;;  %s784_s4 = int_to_ptr.vmem [resolvable:$true] %s783_s4 }
  0x16   :  { %v954_v3 = vld [vmem:[#allocation3 + $0x80] sm:$0xff]   ;;  %858 = vmatpush3.bf16.msra.mxu0 %v953_v2  ;;  %v958_v7 = vld [vmem:[#allocation3 + $0x88] sm:$0xff]   ;;  %v961_v10 = vld [vmem:[#allocation3 + $0x10] sm:$0xff]   ;;  %v43_v29 = vunpack.c.0.s8 %v42_v23  ;;  %s1039_s5 = scalar_lea.vmem %s784_s4, 32  ;;  %p1044_p9 = scmp.lt.s32.totalorder %s784_s4, %s784_s4 }
  0x17   :  { %880 = vmatpush3.bf16.msra.mxu1 %v954_v3  ;;  %859 = vmatprep.subr.bf16.mxu0 %v955_v4  ;;  %v962_v11 = vld [vmem:[#allocation3 + $0x90] sm:$0xff]   ;;  %v963_v12 = vld [vmem:[#allocation3 + $0x58] sm:$0xff]   ;;  %v967_v16 = vld [vmem:[#allocation3 + $0x60] sm:$0xff]   ;;  %p1040_p8 = scmp.ne.s32.totalorder %s784_s4, %s1039_s5  ;;  %p1045_p10 = scmp.lt.s32.totalorder %s1039_s5, %s1039_s5 }
  0x18   :  { %881 = vmatprep.subr.bf16.mxu1 %v956_v5  ;;  %v964_v13 = vld [vmem:[#allocation3 + $0xd8] sm:$0xff]   ;;  %v968_v17 = vld [vmem:[#allocation3 + $0xe0] sm:$0xff]   ;;  %v971_v20 = vld [vmem:[#allocation3 + $0x68] sm:$0xff]   ;;  %v1103_v35 = vsub.s32 %v43_v29, %v45_v30 }
  0x19   :  { %v965_v14 = vld [vmem:[#allocation3 + $0x18] sm:$0xff]   ;;  %v969_v18 = vld [vmem:[#allocation3 + $0x20] sm:$0xff]   ;;  %v972_v21 = vld [vmem:[#allocation3 + $0xe8] sm:$0xff]   ;;  %p1046_p11 = por %p1045_p10, %p1044_p9 }
  0x1a   :  { %860 = vmatpush3.bf16.msra.mxu0 %v957_v6  ;;  %v966_v15 = vld [vmem:[#allocation3 + $0x98] sm:$0xff]   ;;  %v970_v19 = vld [vmem:[#allocation3 + $0xa0] sm:$0xff]   ;;  %v973_v25 = vld [vmem:[#allocation3 + $0x28] sm:$0xff]  }
  0x1b   :  { %882 = vmatpush3.bf16.msra.mxu1 %v958_v7  ;;  %861 = vmatprep.subr.bf16.mxu0 %v959_v8  ;;  %v974_v26 = vld [vmem:[#allocation3 + $0xa8] sm:$0xff]   ;;  %v975_v27 = vld [vmem:[#allocation3 + $0x70] sm:$0xff]   ;;  %v979_v33 = vld [vmem:[#allocation3 + $0x78] sm:$0xff]   ;;  %p1047_p12 = pnand %p1046_p11, %p1040_p8 }
  0x1c   :  { %883 = vmatprep.subr.bf16.mxu1 %v960_v9  ;;  %v976_v28 = vld [vmem:[#allocation3 + $0xf0] sm:$0xff]   ;;  %v980_v34 = vld [vmem:[#allocation3 + $0xf8] sm:$0xff]   ;;  %v984_v41 = vld [vmem:[#allocation3 + $0x140] sm:$0xff]  }
  0x1d   :  { %v977_v31 = vld [vmem:[#allocation3 + $0x30] sm:$0xff]   ;;  %v981_v36 = vld [vmem:[#allocation3 + $0x38] sm:$0xff]   ;;  %v985_v42 = vld [vmem:[#allocation3 + $0x1c0] sm:$0xff]  }
  0x1e   :  { %862 = vmatpush3.bf16.msra.mxu0 %v961_v10  ;;  %v978_v32 = vld [vmem:[#allocation3 + $0xb0] sm:$0xff]   ;;  %v982_v37 = vld [vmem:[#allocation3 + $0xb8] sm:$0xff]   ;;  %v986_v48 = vld [vmem:[#allocation3 + $0x100] sm:$0xff]  }
  0x1f   :  { %884 = vmatpush3.bf16.msra.mxu1 %v962_v11  ;;  %863 = vmatprep.subr.bf16.mxu0 %v963_v12  ;;  %v36_v38 = vld [vmem:[%s1130_s0] sm:$0xff]  ;;  %v988_v50 = vld [vmem:[#allocation3 + $0x148] sm:$0xff]   ;;  %v992_v55 = vld [vmem:[#allocation3 + $0x150] sm:$0xff]  }
  0x20   :  { %885 = vmatprep.subr.bf16.mxu1 %v964_v13  ;;  %v47_v39 = vrot.slane %v36_v38, %v1103_v35  ;;  %v40_v40 = vcombine.high %v36_v38, %v36_v38  ;;  %v987_v52 = vld [vmem:[#allocation3 + $0x180] sm:$0xff]   ;;  %v989_v53 = vld [vmem:[#allocation3 + $0x1c8] sm:$0xff]   ;;  %v993_v57 = vld [vmem:[#allocation3 + $0x1d0] sm:$0xff]  }
  0x21   :  { %v990_v54 = vld [vmem:[#allocation3 + $0x108] sm:$0xff]   ;;  %v994_v58 = vld [vmem:[#allocation3 + $0x110] sm:$0xff]   ;;  %v996_v59 = vld [vmem:[#allocation3 + $0x158] sm:$0xff]  }
  0x22   :  { %864 = vmatpush3.bf16.msra.mxu0 %v965_v14  ;;  %v55_v43 = vcombine.high %v47_v39, %v47_v39  ;;  %v54_v44 = vrot.slane %v40_v40, %v1103_v35  ;;  %v82_v45 = vpack.c.bf16 %v47_v39, %v47_v39  ;;  %v991_v56 = vld [vmem:[#allocation3 + $0x188] sm:$0xff]   ;;  %v995_v60 = vld [vmem:[#allocation3 + $0x190] sm:$0xff]   ;;  %v997_v61 = vld [vmem:[#allocation3 + $0x1d8] sm:$0xff]  }
  0x23   :  { %886 = vmatpush3.bf16.msra.mxu1 %v966_v15  ;;  %865 = vmatprep.subr.bf16.mxu0 %v967_v16  ;;  %v998_v62 = vld [vmem:[#allocation3 + $0x118] sm:$0xff]   ;;  %v1000_v63 = vld [vmem:[#allocation3 + $0x160] sm:$0xff]   ;;  %v1004_v3 = vld [vmem:[#allocation3 + $0x168] sm:$0xff]  }
  0x24   :  { %887 = vmatprep.subr.bf16.mxu1 %v968_v17  ;;  %v83_v46 = vpack.c.bf16 %v55_v43, %v55_v43  ;;  %v56_v47 = vcombine.high %v54_v44, %v54_v44  ;;  %v84_v49 = vpack.c.bf16 %v54_v44, %v54_v44  ;;  %v999_v0 = vld [vmem:[#allocation3 + $0x198] sm:$0xff]   ;;  %v1001_v1 = vld [vmem:[#allocation3 + $0x1e0] sm:$0xff]   ;;  %v1005_v5 = vld [vmem:[#allocation3 + $0x1e8] sm:$0xff]  }
  0x25   :  { %v1002_v2 = vld [vmem:[#allocation3 + $0x120] sm:$0xff]   ;;  %v1006_v6 = vld [vmem:[#allocation3 + $0x128] sm:$0xff]   ;;  %v1008_v7 = vld [vmem:[#allocation3 + $0x170] sm:$0xff]  }
  0x26   :  { %866 = vmatpush3.bf16.msra.mxu0 %v969_v18  ;;  %634 = vmatprep.mubr.bf16.mxu0 %v83_v46  ;;  %v85_v51 = vpack.c.bf16 %v56_v47, %v56_v47  ;;  %v1003_v4 = vld [vmem:[#allocation3 + $0x1a0] sm:$0xff]   ;;  %v1007_v8 = vld [vmem:[#allocation3 + $0x1a8] sm:$0xff]   ;;  %v1009_v9 = vld [vmem:[#allocation3 + $0x1f0] sm:$0xff]  }
  0x27   :  { %888 = vmatpush3.bf16.msra.mxu1 %v970_v19  ;;  %867 = vmatprep.subr.bf16.mxu0 %v971_v20  ;;  %v1010_v10 = vld [vmem:[#allocation3 + $0x130] sm:$0xff]   ;;  %v1012_v11 = vld [vmem:[#allocation3 + $0x178] sm:$0xff]   ;;  %v37_v14 = vld [vmem:[%s1130_s0 + $0x8] sm:$0xff] }
  0x28   :  { %889 = vmatprep.subr.bf16.mxu1 %v972_v21  ;;  %674 = vmatprep.mubr.bf16.mxu1 %v85_v51  ;;  %v1011_v12 = vld [vmem:[#allocation3 + $0x1b0] sm:$0xff]   ;;  %v1013_v13 = vld [vmem:[#allocation3 + $0x1f8] sm:$0xff]   ;;  %v64_v16 = vrot.slane %v37_v14, %v1103_v35  ;;  %v57_v17 = vcombine.high %v37_v14, %v37_v14 }
  0x29   :  { %v1014_v15 = vld [vmem:[#allocation3 + $0x138] sm:$0xff]  }
  0x2a   :  { %868 = vmatpush3.bf16.msra.mxu0 %v973_v25  ;;  %v1015_v18 = vld [vmem:[#allocation3 + $0x1b8] sm:$0xff]   ;;  %v72_v19 = vcombine.high %v64_v16, %v64_v16  ;;  %v71_v20 = vrot.slane %v57_v17, %v1103_v35  ;;  %v86_v21 = vpack.c.bf16 %v64_v16, %v64_v16 }
  0x2b   :  { %890 = vmatpush3.bf16.msra.mxu1 %v974_v26  ;;  %869 = vmatprep.subr.bf16.mxu0 %v975_v27  ;;  %v1069_v26 = vmov 0.0  }
  0x2c   :  { %891 = vmatprep.subr.bf16.mxu1 %v976_v28  ;;  %v87_v22 = vpack.c.bf16 %v72_v19, %v72_v19  ;;  %v73_v23 = vcombine.high %v71_v20, %v71_v20  ;;  %v88_v24 = vpack.c.bf16 %v71_v20, %v71_v20  ;;  %34 = vst [vmem:[#allocation2] sm:$0x3] %v1069_v26 }
  0x2e   :  { %870 = vmatpush3.bf16.msra.mxu0 %v977_v31  ;;  %v89_v25 = vpack.c.bf16 %v73_v23, %v73_v23 }
  0x2f   :  { %892 = vmatpush3.bf16.msra.mxu1 %v978_v32  ;;  %871 = vmatprep.subr.bf16.mxu0 %v979_v33 }
  0x30   :  { %893 = vmatprep.subr.bf16.mxu1 %v980_v34 }
  0x32   :  { %872 = vmatpush3.bf16.msra.mxu0 %v981_v36 }
  0x33   :  { %894 = vmatpush3.bf16.msra.mxu1 %v982_v37  ;;  %901 = vmatprep.subr.bf16.mxu0 %v984_v41 }
  0x34   :  { %923 = vmatprep.subr.bf16.mxu1 %v985_v42 }
  0x35   :  { %635 = vmatmul.mubr.bf16.vlgmr.msra.gmra.mrb[0].mxu0 %v82_v45 }
  0x36   :  { %902 = vmatpush3.bf16.msra.mxu0 %v986_v48  ;;  %675 = vmatmul.mubr.bf16.vlgmr.msra.gmra.mrb[0].mxu1 %v84_v49  ;;  %v35_v48 = vld [vmem:[#allocation2] sm:$0x3] }
  0x37   :  { %903 = vmatprep.subr.bf16.mxu0 %v988_v50  ;;  %924 = vmatpush3.bf16.msra.mxu1 %v987_v52  ;;  %v856_v52 = vld [vmem:[%s1132_s2] ss:$0 sm:$0xff] }
  0x38   :  { %925 = vmatprep.subr.bf16.mxu1 %v989_v53  ;;  %714 = vmatprep.mubr.bf16.mxu0 %v87_v22 }
  0x39   :  { %754 = vmatprep.mubr.bf16.mxu1 %v89_v25 }
  0x3a   :  { %904 = vmatpush3.bf16.msra.mxu0 %v990_v54 }
  0x3b   :  { %905 = vmatprep.subr.bf16.mxu0 %v992_v55  ;;  %926 = vmatpush3.bf16.msra.mxu1 %v991_v56 }
  0x3c   :  { %927 = vmatprep.subr.bf16.mxu1 %v993_v57 }
  0x3e   :  { %906 = vmatpush3.bf16.msra.mxu0 %v994_v58 }
  0x3f   :  { %907 = vmatprep.subr.bf16.mxu0 %v996_v59  ;;  %928 = vmatpush3.bf16.msra.mxu1 %v995_v60 }
  0x40   :  { %929 = vmatprep.subr.bf16.mxu1 %v997_v61 }
  0x42   :  { %908 = vmatpush3.bf16.msra.mxu0 %v998_v62 }
  0x43   :  { %909 = vmatprep.subr.bf16.mxu0 %v1000_v63  ;;  %930 = vmatpush3.bf16.msra.mxu1 %v999_v0 }
  0x44   :  { %931 = vmatprep.subr.bf16.mxu1 %v1001_v1 }
  0x46   :  { %910 = vmatpush3.bf16.msra.mxu0 %v1002_v2 }
  0x47   :  { %911 = vmatprep.subr.bf16.mxu0 %v1004_v3  ;;  %932 = vmatpush3.bf16.msra.mxu1 %v1003_v4 }
  0x48   :  { %933 = vmatprep.subr.bf16.mxu1 %v1005_v5 }
  0x4a   :  { %912 = vmatpush3.bf16.msra.mxu0 %v1006_v6 }
  0x4b   :  { %913 = vmatprep.subr.bf16.mxu0 %v1008_v7  ;;  %934 = vmatpush3.bf16.msra.mxu1 %v1007_v8 }
  0x4c   :  { %935 = vmatprep.subr.bf16.mxu1 %v1009_v9 }
  0x4e   :  { %914 = vmatpush3.bf16.msra.mxu0 %v1010_v10 }
  0x4f   :  { %915 = vmatprep.subr.bf16.mxu0 %v1012_v11  ;;  %936 = vmatpush3.bf16.msra.mxu1 %v1011_v12 }
  0x50   :  { %937 = vmatprep.subr.bf16.mxu1 %v1013_v13 }
  0x52   :  { %916 = vmatpush3.bf16.msra.mxu0 %v1014_v15 }
  0x53   :  { %938 = vmatpush3.bf16.msra.mxu1 %v1015_v18 }
  0x55   :  { %715 = vmatmul.mubr.bf16.vlgmr.msra.gmra.mrb[4].mxu0 %v86_v21 }
  0x56   :  { %755 = vmatmul.mubr.bf16.vlgmr.msra.gmra.mrb[4].mxu1 %v88_v24 }
 0x108   :  { %v873_v27 = vpop.f32.mrb[0].mxu0 }
 0x109   :  { %v874_v28 = vpop.f32.mrb[1].mxu0  ;;  %v895_v29 = vpop.f32.mrb[0].mxu1 }
 0x10a   :  { %v875_v30 = vadd.f32 %v874_v28, %v873_v27  ;;  %v876_v31 = vpop.f32.mrb[2].mxu0  ;;  %v896_v32 = vpop.f32.mrb[1].mxu1 }
 0x10b   :  { %v877_v33 = vpop.f32.mrb[3].mxu0  ;;  %v897_v34 = vadd.f32 %v896_v32, %v895_v29  ;;  %v898_v35 = vpop.f32.mrb[2].mxu1 }
 0x10c   :  { %v899_v36 = vpop.f32.mrb[3].mxu1 }
 0x10d   :  { %v677_v37 = vadd.f32 %v897_v34, %v875_v30 }
 0x128   :  { %v917_v38 = vpop.f32.mrb[4].mxu0 }
 0x129   :  { %v918_v39 = vpop.f32.mrb[5].mxu0  ;;  %v939_v40 = vpop.f32.mrb[4].mxu1 }
 0x12a   :  { %v919_v41 = vadd.f32 %v918_v39, %v917_v38  ;;  %v920_v42 = vpop.f32.mrb[6].mxu0  ;;  %v940_v43 = vpop.f32.mrb[5].mxu1 }
 0x12b   :  { %v921_v44 = vpop.f32.mrb[7].mxu0  ;;  %v941_v46 = vadd.f32 %v940_v43, %v939_v40  ;;  %v942_v47 = vpop.f32.mrb[6].mxu1 }
 0x12c   :  { %v717_v45 = vadd.f32 %v919_v41, %v677_v37  ;;  %v943_v49 = vpop.f32.mrb[7].mxu1 }
 0x12e   :  { %v757_v50 = vadd.f32 %v941_v46, %v717_v45 }
 0x130   :  { %v762_v51 = vadd.f32 %v757_v50, %v35_v48 }
 0x132   :  { %763 = vst [vmem:[#allocation2] sm:$0x3] %v762_v51 }
 0x139   :  { %v767_v53 = vld [vmem:[#allocation2] sm:$0x3] }
 0x13a   :  { %v775_v54 = vadd.f32 %v856_v52, %v767_v53 }
 0x13c   :  { %776 = vst [vmem:[#allocation6] sm:$0x3] %v775_v54 }
 0x13d   :  { %1050 = shalt.err (!%p1047_p12)
}
 0x13e   :  { %s1051_s8 = scalar_lea.hbm %s1133_s3, 32 }
 0x13f   :  { %p1052_p13 = scmp.ne.s32.totalorder %s1133_s3, %s1051_s8  ;;  %p1055_p0 = scmp.lt.u32.totalorder %s1051_s8, %s1133_s3 }
 0x141   :  { %p1057_p1 = pnand %p1055_p0, %p1052_p13 }
 0x143   :  { %1060 = shalt.err (!%p1057_p1)
}
 0x144   :  { %786 = dma.vmem_to_hbm [thread:$0]  %s784_s4, 32, %s1133_s3, [#allocation5]  }
 0x145   :  { %1063 = dma.done.wait [#allocation5], 32  }
 0x146   :  { %1064 = vsyncadd [#allocation5], 4294967264 }
 0x147   :  { %790 = vsyncpa [#allocation4], 1 }
 0x148   :  { %791 = vsyncpa [#allocation5], 1 }

</bundles_post_ra>
